<compile_context>
chip_gen: v6e
topology: v6e:2x2x1
jax: 0.10.0
libtpu: 0.0.40
codegen_flags: <defaults>
</compile_context>

<pallas_src>
import jax
import jax.numpy as jnp
from jax.experimental import pallas as pl
from jax.experimental.pallas import tpu as pltpu


# ----------------------------- fused Pallas kernel --------------------------

def _make_fused_kernel(config, n_graphs, last_gcn):
    n_layers = len(config)

    def kernel(idx_ref, adj_ref, feat_ref, *rest):
        # rest = (w0, b0, w1, b1, ..., out_ref, h_scratch)
        wb_refs = rest[: 2 * n_layers]
        out_ref = rest[2 * n_layers]
        h_scratch = rest[2 * n_layers + 1]

        # ---- one-time degree normalisation, shared by every GraphConv ----
        adj = adj_ref[...]                                  # (N, N), adj[dst, src]
        deg = jnp.sum(adj, axis=1, keepdims=True)           # in_degrees, (N, 1)
        norm = jax.lax.rsqrt(jnp.maximum(deg, 1.0))         # clamp(min=1) ** -0.5
        adj_norm = adj * norm                               # dst-side scaling folded in

        h = feat_ref[...]                                   # (N, Fin), VMEM-resident
        for li, (name, (fin, fout)) in enumerate(config):
            w = wb_refs[2 * li][...]
            b = wb_refs[2 * li + 1][...]
            if name == "GraphConv":
                hn = h * norm                               # src-side scaling
                if fin > fout:                              # matmul first
                    r = jnp.dot(adj_norm,
                                jnp.dot(hn, w, preferred_element_type=jnp.float32),
                                preferred_element_type=jnp.float32)
                else:                                       # aggregate, then matmul
                    r = jnp.dot(jnp.dot(adj_norm, hn,
                                        preferred_element_type=jnp.float32),
                                w, preferred_element_type=jnp.float32)
                h = jnp.maximum(r + b, 0.0)                 # bias + F.relu
                if li == last_gcn:
                    # per-graph readout h[to_fetch + offset], indices in SMEM
                    h_scratch[...] = h
                    rows = [h_scratch[pl.ds(idx_ref[g], 1), :]
                            for g in range(n_graphs)]
                    h = jnp.concatenate(rows, axis=0)       # (n_graphs, fout)
            else:                                           # Linear, w pre-transposed
                h = jnp.dot(h, w, preferred_element_type=jnp.float32) + b

        out_ref[...] = h

    return kernel


# ------------------------------ wrapper --------------------------------------

def make_classifier_forward(config, n_nodes, n_graphs, batch_num_nodes):
    names = [name for name, _ in config]
    last_gcn = max(i for i, nm in enumerate(names) if nm == "GraphConv")
    last_gcn_out = config[last_gcn][1][1]
    out_dim = config[-1][1][1]
    in_feats = config[0][1][0]

    kernel = _make_fused_kernel(config, n_graphs, last_gcn)

    in_specs = [
        pl.BlockSpec((n_nodes, n_nodes), lambda i, idx: (0, 0)),
        pl.BlockSpec((n_nodes, in_feats), lambda i, idx: (0, 0)),
    ]
    for _, (fin, fout) in config:
        in_specs.append(pl.BlockSpec((fin, fout), lambda i, idx: (0, 0)))
        in_specs.append(pl.BlockSpec((1, fout), lambda i, idx: (0, 0)))

    grid_spec = pltpu.PrefetchScalarGridSpec(
        num_scalar_prefetch=1,                  # readout indices -> SMEM
        grid=(1,),
        in_specs=in_specs,
        out_specs=pl.BlockSpec((n_graphs, out_dim), lambda i, idx: (0, 0)),
        scratch_shapes=[pltpu.VMEM((n_nodes, last_gcn_out), jnp.float32)],
    )

    fused = pl.pallas_call(
        kernel,
        out_shape=jax.ShapeDtypeStruct((n_graphs, out_dim), jnp.float32),
        grid_spec=grid_spec,
        compiler_params=pltpu.CompilerParams(dimension_semantics=("arbitrary",)),
    )

    offsets = jnp.cumsum(
        jnp.array([0] + list(batch_num_nodes), dtype=jnp.int32))[:-1]

    @jax.jit
    def forward(params, adj, to_fetch, features):
        args = [adj.astype(jnp.float32), features.astype(jnp.float32)]
        for (name, (fin, fout)), (w, b) in zip(config, params):
            w = w.astype(jnp.float32)
            if name == "Linear":
                w = w.T                         # one-time transpose outside the kernel
            args.append(w)
            args.append(b.astype(jnp.float32).reshape(1, fout))
        idx = to_fetch.astype(jnp.int32) + offsets
        out = fused(idx, *args)
        return out, out

    return forward


def init_params(config, key):
    """Deterministic synthetic init matching the torch shapes."""
    params = []
    for name, (fin, fout) in config:
        key, k = jax.random.split(key)
        if name == "Linear":
            # torch: w = ones(out, in) then kaiming_normal_ -> std = sqrt(2/fan_in)
            w = jax.random.normal(k, (fout, fin), jnp.float32) * jnp.sqrt(2.0 / fin)
        else:  # GraphConv: w = Tensor(in, out) then xavier_uniform_
            bound = float(jnp.sqrt(6.0 / (fin + fout)))
            w = jax.random.uniform(k, (fin, fout), jnp.float32, -bound, bound)
        b = jnp.zeros((fout,), jnp.float32)
        params.append((w, b))
    return params


# --------------------------- pure-JAX reference -----------------------------

def ref_forward(config, params, adj, batch_num_nodes, to_fetch, features):
    h = features.astype(jnp.float32)
    n_gcn = sum(1 for name, _ in config if name == "GraphConv")
    idx_gcn = 0
    for (name, _), (w, b) in zip(config, params):
        if name == "GraphConv":
            deg = adj.sum(axis=1, keepdims=True)
            norm = jnp.maximum(deg, 1.0) ** -0.5
            feat = h * norm
            fin, fout = w.shape
            if fin > fout:
                rst = adj @ (feat @ w)
            else:
                rst = (adj @ feat) @ w
            h = jax.nn.relu(rst * norm + b)
            idx_gcn += 1
            if idx_gcn == n_gcn:
                offset = jnp.cumsum(jnp.array([0] + list(batch_num_nodes)))[:-1]
                h = h[to_fetch + offset]
        else:
            h = h @ w.T + b
    return h, h


# --------------------------------- main -------------------------------------

if __name__ == "__main__":
    # 2 graphs of 8 nodes each, batched into one block-diagonal graph of N=16.
    n_graphs, nodes_per_graph = 2, 8
    N = n_graphs * nodes_per_graph
    in_feats, hidden, n_classes = 8, 32, 4

    config = [
        ("GraphConv", (in_feats, hidden)),
        ("GraphConv", (hidden, hidden)),
        ("Linear", (hidden, n_classes)),
    ]

    key = jax.random.PRNGKey(0)
    k_adj, k_feat, k_param = jax.random.split(key, 3)

    node_graph = jnp.repeat(jnp.arange(n_graphs), nodes_per_graph)
    block_mask = (node_graph[:, None] == node_graph[None, :]).astype(jnp.float32)
    adj = jax.random.bernoulli(k_adj, 0.4, (N, N)).astype(jnp.float32) * block_mask

    features = jax.random.normal(k_feat, (N, in_feats), jnp.float32)
    to_fetch = jnp.array([3, 5], dtype=jnp.int32)        # one node per graph
    batch_num_nodes = [nodes_per_graph] * n_graphs

    params = init_params(config, k_param)

    forward = make_classifier_forward(config, N, n_graphs, batch_num_nodes)
    out, out2 = forward(params, adj, to_fetch, features)
    jax.block_until_ready(out)

    ref, _ = ref_forward(config, params, adj, batch_num_nodes, to_fetch, features)
    assert out.shape == (n_graphs, n_classes)
    assert jnp.allclose(out, ref, atol=1e-4, rtol=1e-4), "mismatch vs reference"

    print("KERNEL_OK")
</pallas_src>

<mosaic_0001>
module attributes {stable_mosaic.version = 11 : i64} {
  func.func @kernel(%arg0: i32, %arg1: memref<2xi32, #tpu.memory_space<smem>>, %arg2: memref<16x16xf32, #tpu.memory_space<vmem>>, %arg3: memref<16x8xf32, #tpu.memory_space<vmem>>, %arg4: memref<8x32xf32, #tpu.memory_space<vmem>>, %arg5: memref<1x32xf32, #tpu.memory_space<vmem>>, %arg6: memref<32x32xf32, #tpu.memory_space<vmem>>, %arg7: memref<1x32xf32, #tpu.memory_space<vmem>>, %arg8: memref<32x4xf32, #tpu.memory_space<vmem>>, %arg9: memref<1x4xf32, #tpu.memory_space<vmem>>, %arg10: memref<2x4xf32, #tpu.memory_space<vmem>>, %arg11: memref<16x32xf32, #tpu.memory_space<vmem>>) attributes {dimension_semantics = [#tpu.dimension_semantics<arbitrary>], iteration_bounds = array<i64: 1>, scalar_prefetch = 1 : i64, scratch_operands = 1 : i64, tpu.core_type = #tpu.core_type<tc>, window_params = [{pipeline_mode = #tpu.pipeline_mode<synchronous>, transform_indices = @transform_0, window_bounds = array<i64: 16, 16>}, {pipeline_mode = #tpu.pipeline_mode<synchronous>, transform_indices = @transform_1, window_bounds = array<i64: 16, 8>}, {pipeline_mode = #tpu.pipeline_mode<synchronous>, transform_indices = @transform_2, window_bounds = array<i64: 8, 32>}, {pipeline_mode = #tpu.pipeline_mode<synchronous>, transform_indices = @transform_3, window_bounds = array<i64: 1, 32>}, {pipeline_mode = #tpu.pipeline_mode<synchronous>, transform_indices = @transform_4, window_bounds = array<i64: 32, 32>}, {pipeline_mode = #tpu.pipeline_mode<synchronous>, transform_indices = @transform_5, window_bounds = array<i64: 1, 32>}, {pipeline_mode = #tpu.pipeline_mode<synchronous>, transform_indices = @transform_6, window_bounds = array<i64: 32, 4>}, {pipeline_mode = #tpu.pipeline_mode<synchronous>, transform_indices = @transform_7, window_bounds = array<i64: 1, 4>}, {pipeline_mode = #tpu.pipeline_mode<synchronous>, transform_indices = @transform_8, window_bounds = array<i64: 2, 4>}]} {
    %c0 = arith.constant 0 : index
    %c0_0 = arith.constant 0 : index
    %0 = vector.load %arg2[%c0, %c0_0] : memref<16x16xf32, #tpu.memory_space<vmem>>, vector<16x16xf32>
    %cst = arith.constant dense<0.000000e+00> : vector<16xf32>
    %1 = vector.multi_reduction <add>, %0, %cst [1] : vector<16x16xf32> to vector<16xf32>
    %2 = vector.shape_cast %1 : vector<16xf32> to vector<16x1xf32>
    %cst_1 = arith.constant 1.000000e+00 : f32
    %3 = vector.broadcast %cst_1 : f32 to vector<16x1xf32>
    %4 = arith.maximumf %2, %3 : vector<16x1xf32>
    %5 = math.rsqrt %4 : vector<16x1xf32>
    %6 = vector.broadcast %5 : vector<16x1xf32> to vector<16x16xf32>
    %7 = arith.mulf %0, %6 : vector<16x16xf32>
    %c0_2 = arith.constant 0 : index
    %c0_3 = arith.constant 0 : index
    %8 = vector.load %arg3[%c0_2, %c0_3] : memref<16x8xf32, #tpu.memory_space<vmem>>, vector<16x8xf32>
    %c0_4 = arith.constant 0 : index
    %c0_5 = arith.constant 0 : index
    %9 = vector.load %arg4[%c0_4, %c0_5] : memref<8x32xf32, #tpu.memory_space<vmem>>, vector<8x32xf32>
    %c0_6 = arith.constant 0 : index
    %c0_7 = arith.constant 0 : index
    %10 = vector.load %arg5[%c0_6, %c0_7] : memref<1x32xf32, #tpu.memory_space<vmem>>, vector<1x32xf32>
    %11 = vector.broadcast %5 : vector<16x1xf32> to vector<16x8xf32>
    %12 = arith.mulf %8, %11 : vector<16x8xf32>
    %cst_8 = arith.constant dense<0.000000e+00> : vector<16x8xf32>
    %13 = tpu.matmul %7, %12, %cst_8 {dimension_numbers = #tpu.dot_dimension_numbers<[1], [0], [0], [1], [0, 0, 1, 1], [], []>} : vector<16x16xf32>, vector<16x8xf32>, vector<16x8xf32> -> vector<16x8xf32>
    %cst_9 = arith.constant dense<0.000000e+00> : vector<16x32xf32>
    %14 = tpu.matmul %13, %9, %cst_9 {dimension_numbers = #tpu.dot_dimension_numbers<[1], [0], [0], [1], [0, 0, 1, 1], [], []>} : vector<16x8xf32>, vector<8x32xf32>, vector<16x32xf32> -> vector<16x32xf32>
    %15 = vector.broadcast %10 : vector<1x32xf32> to vector<16x32xf32>
    %16 = arith.addf %14, %15 : vector<16x32xf32>
    %cst_10 = arith.constant 0.000000e+00 : f32
    %17 = vector.broadcast %cst_10 : f32 to vector<16x32xf32>
    %18 = arith.maximumf %16, %17 : vector<16x32xf32>
    %c0_11 = arith.constant 0 : index
    %c0_12 = arith.constant 0 : index
    %19 = vector.load %arg6[%c0_11, %c0_12] : memref<32x32xf32, #tpu.memory_space<vmem>>, vector<32x32xf32>
    %c0_13 = arith.constant 0 : index
    %c0_14 = arith.constant 0 : index
    %20 = vector.load %arg7[%c0_13, %c0_14] : memref<1x32xf32, #tpu.memory_space<vmem>>, vector<1x32xf32>
    %21 = vector.broadcast %5 : vector<16x1xf32> to vector<16x32xf32>
    %22 = arith.mulf %18, %21 : vector<16x32xf32>
    %cst_15 = arith.constant dense<0.000000e+00> : vector<16x32xf32>
    %23 = tpu.matmul %7, %22, %cst_15 {dimension_numbers = #tpu.dot_dimension_numbers<[1], [0], [0], [1], [0, 0, 1, 1], [], []>} : vector<16x16xf32>, vector<16x32xf32>, vector<16x32xf32> -> vector<16x32xf32>
    %cst_16 = arith.constant dense<0.000000e+00> : vector<16x32xf32>
    %24 = tpu.matmul %23, %19, %cst_16 {dimension_numbers = #tpu.dot_dimension_numbers<[1], [0], [0], [1], [0, 0, 1, 1], [], []>} : vector<16x32xf32>, vector<32x32xf32>, vector<16x32xf32> -> vector<16x32xf32>
    %25 = vector.broadcast %20 : vector<1x32xf32> to vector<16x32xf32>
    %26 = arith.addf %24, %25 : vector<16x32xf32>
    %cst_17 = arith.constant 0.000000e+00 : f32
    %27 = vector.broadcast %cst_17 : f32 to vector<16x32xf32>
    %28 = arith.maximumf %26, %27 : vector<16x32xf32>
    %c0_18 = arith.constant 0 : index
    %c0_19 = arith.constant 0 : index
    %29 = vector.load %arg11[%c0_18, %c0_19] : memref<16x32xf32, #tpu.memory_space<vmem>>, vector<16x32xf32>
    tpu.vector_store %arg11[%c0_18, %c0_19], %28 {strides = array<i32>} : memref<16x32xf32, #tpu.memory_space<vmem>>, vector<16x32xf32>,
    %c0_20 = arith.constant 0 : index
    %30 = memref.load %arg1[%c0_20] : memref<2xi32, #tpu.memory_space<smem>>
    %31 = arith.index_cast %30 : i32 to index
    %c0_21 = arith.constant 0 : index
    %32 = vector.load %arg11[%31, %c0_21] : memref<16x32xf32, #tpu.memory_space<vmem>>, vector<1x32xf32>
    %c1 = arith.constant 1 : index
    %33 = memref.load %arg1[%c1] : memref<2xi32, #tpu.memory_space<smem>>
    %34 = arith.index_cast %33 : i32 to index
    %c0_22 = arith.constant 0 : index
    %35 = vector.load %arg11[%34, %c0_22] : memref<16x32xf32, #tpu.memory_space<vmem>>, vector<1x32xf32>
    %36 = tpu.concatenate %32, %35 in 0 : vector<1x32xf32>, vector<1x32xf32> -> vector<2x32xf32>
    %c0_23 = arith.constant 0 : index
    %c0_24 = arith.constant 0 : index
    %37 = vector.load %arg8[%c0_23, %c0_24] : memref<32x4xf32, #tpu.memory_space<vmem>>, vector<32x4xf32>
    %c0_25 = arith.constant 0 : index
    %c0_26 = arith.constant 0 : index
    %38 = vector.load %arg9[%c0_25, %c0_26] : memref<1x4xf32, #tpu.memory_space<vmem>>, vector<1x4xf32>
    %cst_27 = arith.constant dense<0.000000e+00> : vector<2x4xf32>
    %39 = tpu.matmul %36, %37, %cst_27 {dimension_numbers = #tpu.dot_dimension_numbers<[1], [0], [0], [1], [0, 0, 1, 1], [], []>} : vector<2x32xf32>, vector<32x4xf32>, vector<2x4xf32> -> vector<2x4xf32>
    %40 = vector.broadcast %38 : vector<1x4xf32> to vector<2x4xf32>
    %41 = arith.addf %39, %40 : vector<2x4xf32>
    %c0_28 = arith.constant 0 : index
    %c0_29 = arith.constant 0 : index
    %42 = vector.load %arg10[%c0_28, %c0_29] : memref<2x4xf32, #tpu.memory_space<vmem>>, vector<2x4xf32>
    tpu.vector_store %arg10[%c0_28, %c0_29], %41 {strides = array<i32>} : memref<2x4xf32, #tpu.memory_space<vmem>>, vector<2x4xf32>,
    return
  }
  func.func @transform_0(%arg0: i32, %arg1: memref<2xi32, #tpu.memory_space<smem>>) -> (i32, i32) {
    %c0_i32 = arith.constant 0 : i32
    %c0_i32_0 = arith.constant 0 : i32
    %c0_i32_1 = arith.constant 0 : i32
    return %c0_i32, %c0_i32_0 : i32, i32
  }
  func.func @transform_1(%arg0: i32, %arg1: memref<2xi32, #tpu.memory_space<smem>>) -> (i32, i32) {
    %c0_i32 = arith.constant 0 : i32
    %c0_i32_0 = arith.constant 0 : i32
    %c0_i32_1 = arith.constant 0 : i32
    return %c0_i32, %c0_i32_0 : i32, i32
  }
  func.func @transform_2(%arg0: i32, %arg1: memref<2xi32, #tpu.memory_space<smem>>) -> (i32, i32) {
    %c0_i32 = arith.constant 0 : i32
    %c0_i32_0 = arith.constant 0 : i32
    %c0_i32_1 = arith.constant 0 : i32
    return %c0_i32, %c0_i32_0 : i32, i32
  }
  func.func @transform_3(%arg0: i32, %arg1: memref<2xi32, #tpu.memory_space<smem>>) -> (i32, i32) {
    %c0_i32 = arith.constant 0 : i32
    %c0_i32_0 = arith.constant 0 : i32
    %c0_i32_1 = arith.constant 0 : i32
    return %c0_i32, %c0_i32_0 : i32, i32
  }
  func.func @transform_4(%arg0: i32, %arg1: memref<2xi32, #tpu.memory_space<smem>>) -> (i32, i32) {
    %c0_i32 = arith.constant 0 : i32
    %c0_i32_0 = arith.constant 0 : i32
    %c0_i32_1 = arith.constant 0 : i32
    return %c0_i32, %c0_i32_0 : i32, i32
  }
  func.func @transform_5(%arg0: i32, %arg1: memref<2xi32, #tpu.memory_space<smem>>) -> (i32, i32) {
    %c0_i32 = arith.constant 0 : i32
    %c0_i32_0 = arith.constant 0 : i32
    %c0_i32_1 = arith.constant 0 : i32
    return %c0_i32, %c0_i32_0 : i32, i32
  }
  func.func @transform_6(%arg0: i32, %arg1: memref<2xi32, #tpu.memory_space<smem>>) -> (i32, i32) {
    %c0_i32 = arith.constant 0 : i32
    %c0_i32_0 = arith.constant 0 : i32
    %c0_i32_1 = arith.constant 0 : i32
    return %c0_i32, %c0_i32_0 : i32, i32
  }
  func.func @transform_7(%arg0: i32, %arg1: memref<2xi32, #tpu.memory_space<smem>>) -> (i32, i32) {
    %c0_i32 = arith.constant 0 : i32
    %c0_i32_0 = arith.constant 0 : i32
    %c0_i32_1 = arith.constant 0 : i32
    return %c0_i32, %c0_i32_0 : i32, i32
  }
  func.func @transform_8(%arg0: i32, %arg1: memref<2xi32, #tpu.memory_space<smem>>) -> (i32, i32) {
    %c0_i32 = arith.constant 0 : i32
    %c0_i32_0 = arith.constant 0 : i32
    %c0_i32_1 = arith.constant 0 : i32
    return %c0_i32, %c0_i32_0 : i32, i32
  }
}

</mosaic_0001>

<bundles_post_ra>
// kernel: forward.1
= control target key start
LH: loop header
LB: loop body
LE: loop exit
PB: predicated region body
PF: predicated region fallthrough
CT: control target
= control target key end

     0   :  { %s720_s0 = inlined_call_operand.vmem [shape: s32[2], index: 0, kind: input, shape index: {}]   ;;  %s721_s1 = inlined_call_operand.vmem [shape: f32[16,16], index: 1, kind: input, shape index: {}]   ;;  %s722_s2 = inlined_call_operand.vmem [shape: f32[16,8], index: 2, kind: input, shape index: {}]   ;;  %s723_s3 = inlined_call_operand.vmem [shape: f32[8,32], index: 3, kind: input, shape index: {}]   ;;  %s724_s4 = inlined_call_operand.vmem [shape: f32[1,32], index: 4, kind: input, shape index: {}]   ;;  %s725_s5 = inlined_call_operand.vmem [shape: f32[32,32], index: 5, kind: input, shape index: {}]   ;;  %s726_s6 = inlined_call_operand.vmem [shape: f32[1,32], index: 6, kind: input, shape index: {}]   ;;  %s727_s7 = inlined_call_operand.vmem [shape: f32[32,4], index: 7, kind: input, shape index: {}]   ;;  %s728_s8 = inlined_call_operand.vmem [shape: f32[1,4], index: 8, kind: input, shape index: {}]   ;;  %s729_s9 = inlined_call_operand.vmem [shape: f32[2,4], index: 9, kind: output, shape index: {}]  }
   0x1   :  { %s14_s11 = sshll.u32 %s720_s0, 4  ;;  %s15_s11 = int_to_ptr.vmem [resolvable:$true] %s14_s11 }
   0x2   :  { %s588_s12 = scalar_lea.vmem %s15_s11, 16  ;;  %p593_p1 = scmp.lt.s32.totalorder %s15_s11, %s15_s11 }
   0x3   :  { %p589_p0 = scmp.ne.s32.totalorder %s15_s11, %s588_s12  ;;  %p594_p2 = scmp.lt.s32.totalorder %s588_s12, %s588_s12 }
   0x5   :  { %p595_p3 = por %p594_p2, %p593_p1 }
   0x7   :  { %p596_p4 = pnand %p595_p3, %p589_p0 }
   0x9   :  { %599 = shalt.err (!%p596_p4)  }
   0xa   :  { %s602_s13 = smov [#allocation4]  }
   0xb   :  { %17 = dma.vmem_to_smem %s15_s11, 16, %s602_s13, [#allocation3] }
   0xc   :  { %600 = dma.done.wait [#allocation3], 16 }
   0xd   :  { %601 = vsyncadd [#allocation3], 4294967280 }
   0xe   :  { %19 = sfence }
   0xf   :  { %v37_v0 = vld [vmem:[%s721_s1 + $0x8] sm:$0xff]  ;;  %vm38_vm0 = vcmask 130048   ;;  %v36_v1 = vld [vmem:[%s721_s1] sm:$0xff]  ;;  %vm144_vm1 = vcmask 64512   ;;  %v231_v19 = vld [vmem:[%s725_s5 + $0x18] sm:$0xff]  ;;  %vm316_vm2 = vcmask 261120  }
  0x10   :  { %v42_v2 = vsel %vm38_vm0, %v37_v0, 0.0  ;;  %v39_v3 = vsel %vm38_vm0, %v36_v1, 0.0  ;;  %v52_v8 = vld [vmem:[%s722_s2 + $0x8] sm:$0xff]  ;;  %v51_v11 = vld [vmem:[%s722_s2] sm:$0xff]  ;;  %v230_v20 = vld [vmem:[%s725_s5 + $0x10] sm:$0xff]  ;;  %v603_v35 = vmov 0.0  }
  0x11   :  { %43 = vadd.xlane.f32.xlu0 %v42_v2  ;;  %v53_v16 = vld [vmem:[%s723_s3] sm:$0xff]  ;;  %v229_v30 = vld [vmem:[%s725_s5 + $0x8] sm:$0xff]  ;;  %v416_v34 = vld [vmem:[%s727_s7 + $0x18] sm:$0xff]  ;;  %vm604_vm3 = vmmov 0   ;;  %s515_s0 = sld [smem:[#allocation4 + $0x1]]  ;;  %vm411_vm4 = vcmask 1040384  }
  0x12   :  { %547 = vmatprep.subr.mxu1 %v53_v16  ;;  %v507_v21 = vld [vmem:[%s724_s4] ss:$0 sm:$0xff]  ;;  %v415_v36 = vld [vmem:[%s727_s7 + $0x10] sm:$0xff]  ;;  %v414_v37 = vld [vmem:[%s727_s7 + $0x8] sm:$0xff]  ;;  %s402_s17 = sld [smem:[#allocation4]]  ;;  %vm497_vm5 = vcmask 25600  }
  0x13   :  { %548 = vmatpush3.msra.mxu1 %v53_v16  ;;  %v228_v31 = vld [vmem:[%s725_s5] sm:$0xff] }
  0x14   :  { %v413_v38 = vld [vmem:[%s727_s7] sm:$0xff] }
  0x15   :  { %40 = vadd.xlane.f32.xlu0 %v39_v3  ;;  %v512_v39 = vld [vmem:[%s726_s6] ss:$0 sm:$0xff] }
  0x16   :  { %v516_v50 = vld [vmem:[%s728_s8] ss:$0 sm:$0xff] }
  0x17   :  { %s406_s7 = scalar_lea.vmem [#allocation2], %s515_s0 }
  0x18   :  { %s403_s18 = scalar_lea.vmem [#allocation2], %s402_s17 }
  0x9a   :  { %v44_v4 = vpop.xlane.xlu0 %43 }
  0x9b   :  { %v46_v5 = vmax.f32 %v44_v4, 1.0 }
  0x9d   :  { %584 = vrsqrt.f32 %v46_v5 }
  0x9e   :  { %v41_v6 = vpop.xlane.xlu0 %40 }
  0x9f   :  { %v45_v7 = vmax.f32 %v41_v6, 1.0 }
  0xa1   :  { %586 = vrsqrt.f32 %v45_v7 }
  0xaa   :  { %v585_v9 = vpop.eup %584 }
  0xab   :  { %v56_v10 = vmul.f32 %v585_v9, %v52_v8  ;;  %v50_v15 = vmul.f32 %v585_v9, %v37_v0 }
  0xad   :  { %540 = vmatprep.subr.mxu0 %v56_v10 }
  0xae   :  { %v587_v12 = vpop.eup %586  ;;  %541 = vmatpush3.msra.mxu0 %v56_v10 }
  0xaf   :  { %v55_v13 = vmul.f32 %v587_v12, %v51_v11  ;;  %v49_v14 = vmul.f32 %v587_v12, %v36_v1 }
  0xb1   :  { %542 = vmatprep.subr.mxu0 %v55_v13  ;;  %544 = vmatprep.mubr.msk.f32.mxu0 %vm38_vm0, %v49_v14 }
  0xb2   :  { %543 = vmatpush3.msra.mxu0 %v55_v13 }
  0xb3   :  { %545 = vmatmul.mubr.msk.f32.vlgmr.msra.gmra.mxu0 %vm38_vm0, %v50_v15  ;;  %559 = vmatprep.subr.mxu0 %v231_v19 }
  0xb4   :  { %560 = vmatpush3.msra.mxu0 %v231_v19 }
  0xb5   :  { %561 = vmatprep.subr.mxu0 %v230_v20 }
  0xb6   :  { %562 = vmatpush3.msra.mxu0 %v230_v20 }
  0xb7   :  { %563 = vmatprep.subr.mxu0 %v229_v30 }
  0xb8   :  { %564 = vmatpush3.msra.mxu0 %v229_v30 }
  0xb9   :  { %565 = vmatprep.subr.mxu0 %v228_v31 }
  0xba   :  { %566 = vmatpush3.msra.mxu0 %v228_v31 }
 0x173   :  { %v546_v17 = vpop.f32.mrf.mxu0 }
 0x175   :  { %v129_v18 = vpop.f32.mrf.mxu0 }
 0x176   :  { %549 = vmatprep.mubr.msk.f32.mxu1 %vm144_vm1, %v129_v18 }
 0x177   :  { %550 = vmatmul.mubr.msk.f32.vlgmr.msra.gmra.mxu1 %vm144_vm1, %v546_v17 }
 0x178   :  { %556 = vmatprep.mubr.msk.f32.mxu1 %vm38_vm0, %v49_v14 }
 0x237   :  { %v551_v22 = vpop.f32.mrf.mxu1 }
 0x238   :  { %v223_v23 = vadd.f32 %v551_v22, %v507_v21 }
 0x239   :  { %v217_v24 = vpop.f32.mrf.mxu1 }
 0x23a   :  { %v227_v25 = vmax.f32 %v223_v23, 0.0  ;;  %v218_v26 = vadd.f32 %v507_v21, %v217_v24 }
 0x23c   :  { %v234_v27 = vmul.f32 %v585_v9, %v227_v25  ;;  %v226_v28 = vmax.f32 %v218_v26, 0.0 }
 0x23e   :  { %v233_v29 = vmul.f32 %v587_v12, %v226_v28  ;;  %552 = vmatprep.subr.mxu1 %v234_v27 }
 0x23f   :  { %553 = vmatpush3.msra.mxu1 %v234_v27 }
 0x240   :  { %554 = vmatprep.subr.mxu1 %v233_v29 }
 0x241   :  { %555 = vmatpush3.msra.mxu1 %v233_v29 }
 0x242   :  { %557 = vmatmul.mubr.msk.f32.vlgmr.msra.gmra.mxu1 %vm38_vm0, %v50_v15  ;;  %570 = vmatprep.subr.mxu1 %v603_v35 }
 0x243   :  { %578 = vmatprep.mubr.msk.f32.mxu1 %vm604_vm3, %v603_v35  ;;  %571 = vmatpush3.msra.mxu1 %v416_v34 }
 0x244   :  { %572 = vmatprep.subr.mxu1 %v603_v35 }
 0x245   :  { %573 = vmatpush3.msra.mxu1 %v415_v36 }
 0x246   :  { %574 = vmatprep.subr.mxu1 %v603_v35 }
 0x247   :  { %575 = vmatpush3.msra.mxu1 %v414_v37 }
 0x248   :  { %576 = vmatprep.subr.mxu1 %v603_v35 }
 0x249   :  { %577 = vmatpush3.msra.mxu1 %v413_v38 }
 0x302   :  { %v558_v32 = vpop.f32.mrf.mxu1 }
 0x304   :  { %v301_v33 = vpop.f32.mrf.mxu1 }
 0x305   :  { %567 = vmatprep.mubr.msk.f32.mxu0 %vm316_vm2, %v301_v33 }
 0x306   :  { %568 = vmatmul.mubr.msk.f32.vlgmr.msra.gmra.mxu0 %vm316_vm2, %v558_v32 }
 0x3c6   :  { %v569_v40 = vpop.f32.mrf.mxu0 }
 0x3c7   :  { %v395_v41 = vadd.f32 %v569_v40, %v512_v39 }
 0x3c8   :  { %v389_v42 = vpop.f32.mrf.mxu0 }
 0x3c9   :  { %v399_v43 = vmax.f32 %v395_v41, 0.0  ;;  %v390_v44 = vadd.f32 %v512_v39, %v389_v42 }
 0x3cb   :  { %401 = vst.msk [vmem:[#allocation2 + $0x8] sm:$0xff] %vm316_vm2, %v399_v43  ;;  %v398_v45 = vmax.f32 %v390_v44, 0.0 }
 0x3cd   :  { %400 = vst.msk [vmem:[#allocation2] sm:$0xff] %vm316_vm2, %v398_v45 }
 0x3d4   :  { %v407_v46 = vld [vmem:[%s406_s7] sm:$0x1] }
 0x3d5   :  { %v409_v47 = vrot.slane %v407_v46, 7  ;;  %v404_v48 = vld [vmem:[%s403_s18] sm:$0x1] }
 0x3d7   :  { %v412_v49 = vsel %vm411_vm4, %v404_v48, %v409_v47 }
 0x3d8   :  { %579 = vmatmul.mubr.msk.f32.vlgmr.msra.gmra.mxu1 %vm316_vm2, %v412_v49 }
 0x498   :  { %v493_v51 = vpop.f32.mrf.mxu1 }
 0x499   :  { %v494_v52 = vadd.f32 %v516_v50, %v493_v51 }
 0x49a   :  { %v580_v53 = vpop.f32.mrf.mxu1 }
 0x49b   :  { %498 = vst.msk [vmem:[%s729_s9] sm:$0x3] %vm497_vm5, %v494_v52 }

</bundles_post_ra>
